<compile_context>
chip_gen: v6e
topology: v6e:2x2x1
jax: 0.10.0
libtpu: 0.0.40
codegen_flags: <defaults>
</compile_context>

<pallas_src>
import functools

import jax
import jax.numpy as jnp
from jax import lax
from jax.experimental import pallas as pl
from jax.experimental.pallas import tpu as pltpu


def _decoder_fused_kernel(H, W, x_ref, w1_ref, b1_ref, w2_ref, b2_ref,
                          mask_ref, out_ref, y1_ref):
    # x_ref:    (1, Cin, (H+3)*Wf)  flattened zero-padded input (Wf = W + 2)
    # w1_ref:   (9, Cmid, Cin)      conv1 taps, k = kh*3 + kw
    # b1_ref:   (Cmid, 1)
    # w2_ref:   (9, Cout, Cmid)     deconv taps (ConvTranspose layout, no flip)
    # b2_ref:   (Cout, 1)
    # mask_ref: (1, H*Wf)           1.0 on valid columns (j < W), 0.0 on the 2 pad cols
    # out_ref:  (1, 4, Cout, H*Wf)  4 sub-pixel phases (ee, eo, oe, oo)
    # y1_ref:   (Cmid, (H+2)*Wf)    VMEM scratch holding conv1 output (+ zero tail row)
    Wf = W + 2
    L1 = H * Wf
    Cmid = w1_ref.shape[1]
    LY = y1_ref.shape[1]

    # ---- Conv2d(Cin -> Cmid, 3x3, pad=1) + ReLU : 9 whole-image matmuls ----
    acc1 = jnp.broadcast_to(b1_ref[...], (Cmid, L1))          # init with bias
    for kh in range(3):
        for kw in range(3):
            off = kh * Wf + kw
            patch = x_ref[0, :, pl.ds(off, L1)]               # (Cin, L1)
            acc1 = acc1 + jnp.dot(w1_ref[kh * 3 + kw], patch,
                                  preferred_element_type=jnp.float32)
    y1 = jnp.maximum(acc1, 0.0) * mask_ref[...]               # zero the 2 garbage cols/row

    # keep y1 in VMEM, with a zeroed extra row (acts as bottom zero-padding for phases)
    y1_ref[...] = jnp.zeros((Cmid, LY), jnp.float32)
    y1_ref[:, pl.ds(0, L1)] = y1

    # ---- ConvTranspose2d(k=3, s=2, p=1, op=1) + ReLU via sub-pixel phases ----
    # y2[2i+ph, 2j+pw] uses taps:
    #   ee: (1,1)@y1[i,j]
    #   eo: (1,0)@y1[i,j+1] + (1,2)@y1[i,j]
    #   oe: (0,1)@y1[i+1,j] + (2,1)@y1[i,j]
    #   oo: (0,0)@y1[i+1,j+1] + (0,2)@y1[i+1,j] + (2,0)@y1[i,j+1] + (2,2)@y1[i,j]
    def tap(k, off):
        return jnp.dot(w2_ref[k], y1_ref[:, pl.ds(off, L1)],
                       preferred_element_type=jnp.float32)

    b2 = b2_ref[...]                                          # (Cout, 1)
    ee = b2 + tap(4, 0)
    eo = b2 + tap(3, 1) + tap(5, 0)
    oe = b2 + tap(1, Wf) + tap(7, 0)
    oo = b2 + tap(0, Wf + 1) + tap(2, Wf) + tap(6, 1) + tap(8, 0)

    out_ref[0, 0] = jnp.maximum(ee, 0.0).astype(out_ref.dtype)
    out_ref[0, 1] = jnp.maximum(eo, 0.0).astype(out_ref.dtype)
    out_ref[0, 2] = jnp.maximum(oe, 0.0).astype(out_ref.dtype)
    out_ref[0, 3] = jnp.maximum(oo, 0.0).astype(out_ref.dtype)


def init_decoder_params(key, in_ch, mid_ch, out_ch):
    """Deterministic synthetic params with PyTorch weight layouts."""
    k1, k2, k3, k4 = jax.random.split(key, 4)
    return dict(
        w1=0.1 * jax.random.normal(k1, (mid_ch, in_ch, 3, 3), jnp.float32),   # Conv2d (O,I,kh,kw)
        b1=0.1 * jax.random.normal(k2, (mid_ch,), jnp.float32),
        wt=0.1 * jax.random.normal(k3, (mid_ch, out_ch, 3, 3), jnp.float32),  # ConvTranspose2d (I,O,kh,kw)
        b2=0.1 * jax.random.normal(k4, (out_ch,), jnp.float32),
    )


def decoder_block_forward(x_nchw, params):
    x = x_nchw.astype(jnp.float32)
    N, Cin, H, W = x.shape
    Cmid = params["w1"].shape[0]
    Cout = params["wt"].shape[1]

    Wf = W + 2                 # flat row pitch (incl. left/right halo)
    L1 = H * Wf                # columns computed per image
    LX = (H + 3) * Wf          # padded-flattened input length (1 top / 2 bottom halo rows)
    LY = (H + 2) * Wf          # y1 scratch length (valid rows + zero tail)

    # pad (top=1,bottom=2 / left=1,right=1) and flatten spatially -> (N, Cin, LX)
    xflat = jnp.pad(x, ((0, 0), (0, 0), (1, 2), (1, 1))).reshape(N, Cin, LX)

    # per-tap weights, k = kh*3 + kw
    w1 = jnp.transpose(params["w1"], (2, 3, 0, 1)).reshape(9, Cmid, Cin)   # (9, Cmid, Cin)
    b1 = params["b1"].reshape(Cmid, 1)
    w2 = jnp.transpose(params["wt"], (2, 3, 1, 0)).reshape(9, Cout, Cmid)  # (9, Cout, Cmid)
    b2 = params["b2"].reshape(Cout, 1)

    # 1.0 on valid columns (j < W) within each Wf-wide flattened row
    mask = ((jnp.arange(L1, dtype=jnp.int32) % Wf) < W).astype(jnp.float32).reshape(1, L1)

    kernel = functools.partial(_decoder_fused_kernel, H, W)
    out = pl.pallas_call(
        kernel,
        out_shape=jax.ShapeDtypeStruct((N, 4, Cout, L1), jnp.float32),
        grid=(N,),
        in_specs=[
            pl.BlockSpec((1, Cin, LX), lambda n: (n, 0, 0)),
            pl.BlockSpec((9, Cmid, Cin), lambda n: (0, 0, 0)),
            pl.BlockSpec((Cmid, 1), lambda n: (0, 0)),
            pl.BlockSpec((9, Cout, Cmid), lambda n: (0, 0, 0)),
            pl.BlockSpec((Cout, 1), lambda n: (0, 0)),
            pl.BlockSpec((1, L1), lambda n: (0, 0)),
        ],
        out_specs=pl.BlockSpec((1, 4, Cout, L1), lambda n: (n, 0, 0, 0)),
        scratch_shapes=[pltpu.VMEM((Cmid, LY), jnp.float32)],
        compiler_params=pltpu.CompilerParams(dimension_semantics=("parallel",)),
    )(xflat, w1, b1, w2, b2, mask)

    # layout plumbing: drop the 2 garbage cols per row, interleave the 4 phases
    out = out.reshape(N, 2, 2, Cout, H, Wf)[..., :W]          # (N, ph, pw, Cout, H, W)
    out = jnp.transpose(out, (0, 3, 4, 1, 5, 2))              # (N, Cout, H, ph, W, pw)
    return out.reshape(N, Cout, 2 * H, 2 * W)                 # NCHW, matches PyTorch


def decoder_block_ref(x_nchw, params):
    """Pure-JAX reference (lax convolutions) for correctness checking."""
    dn = ("NCHW", "OIHW", "NCHW")
    y1 = lax.conv_general_dilated(x_nchw, params["w1"], (1, 1),
                                  ((1, 1), (1, 1)), dimension_numbers=dn)
    y1 = jax.nn.relu(y1 + params["b1"][None, :, None, None])
    w2 = jnp.transpose(params["wt"][:, :, ::-1, ::-1], (1, 0, 2, 3))  # OIHW flipped
    y2 = lax.conv_general_dilated(y1, w2, (1, 1), ((1, 2), (1, 2)),
                                  lhs_dilation=(2, 2), dimension_numbers=dn)
    y2 = jax.nn.relu(y2 + params["b2"][None, :, None, None])
    return y2


if __name__ == "__main__":
    key = jax.random.PRNGKey(0)
    kx, kp = jax.random.split(key)

    in_ch, mid_ch, out_ch = 4, 8, 4
    x = jax.random.normal(kx, (2, in_ch, 16, 16), jnp.float32)   # NCHW, like PyTorch
    params = init_decoder_params(kp, in_ch, mid_ch, out_ch)

    out = decoder_block_forward(x, params)
    out = jax.block_until_ready(out)

    ref = decoder_block_ref(x, params)
    assert out.shape == (2, out_ch, 32, 32), out.shape
    assert jnp.allclose(out, ref, atol=1e-4, rtol=1e-4), float(jnp.max(jnp.abs(out - ref)))
    print("KERNEL_OK")
</pallas_src>

<mosaic_0001>
module attributes {stable_mosaic.version = 11 : i64} {
  func.func @_decoder_fused_kernel(%arg0: i32, %arg1: memref<1x4x342xf32, #tpu.memory_space<vmem>>, %arg2: memref<9x8x4xf32, #tpu.memory_space<vmem>>, %arg3: memref<8x1xf32, #tpu.memory_space<vmem>>, %arg4: memref<9x4x8xf32, #tpu.memory_space<vmem>>, %arg5: memref<4x1xf32, #tpu.memory_space<vmem>>, %arg6: memref<1x288xf32, #tpu.memory_space<vmem>>, %arg7: memref<1x4x4x288xf32, #tpu.memory_space<vmem>>, %arg8: memref<8x324xf32, #tpu.memory_space<vmem>>) attributes {dimension_semantics = [#tpu.dimension_semantics<parallel>], iteration_bounds = array<i64: 2>, scalar_prefetch = 0 : i64, scratch_operands = 1 : i64, tpu.core_type = #tpu.core_type<tc>, window_params = [{transform_indices = @transform_0, window_bounds = array<i64: 1, 4, 342>}, {pipeline_mode = #tpu.pipeline_mode<synchronous>, transform_indices = @transform_1, window_bounds = array<i64: 9, 8, 4>}, {pipeline_mode = #tpu.pipeline_mode<synchronous>, transform_indices = @transform_2, window_bounds = array<i64: 8, 1>}, {pipeline_mode = #tpu.pipeline_mode<synchronous>, transform_indices = @transform_3, window_bounds = array<i64: 9, 4, 8>}, {pipeline_mode = #tpu.pipeline_mode<synchronous>, transform_indices = @transform_4, window_bounds = array<i64: 4, 1>}, {pipeline_mode = #tpu.pipeline_mode<synchronous>, transform_indices = @transform_5, window_bounds = array<i64: 1, 288>}, {transform_indices = @transform_6, window_bounds = array<i64: 1, 4, 4, 288>}]} {
    %c0 = arith.constant 0 : index
    %c0_0 = arith.constant 0 : index
    %0 = vector.load %arg3[%c0, %c0_0] : memref<8x1xf32, #tpu.memory_space<vmem>>, vector<8x1xf32>
    %1 = vector.shape_cast %0 : vector<8x1xf32> to vector<8x1xf32>
    %2 = vector.broadcast %1 : vector<8x1xf32> to vector<8x288xf32>
    %c0_1 = arith.constant 0 : index
    %c0_2 = arith.constant 0 : index
    %c0_3 = arith.constant 0 : index
    %3 = vector.load %arg1[%c0_1, %c0_2, %c0_3] : memref<1x4x342xf32, #tpu.memory_space<vmem>>, vector<1x4x288xf32>
    %4 = vector.shape_cast %3 : vector<1x4x288xf32> to vector<4x288xf32>
    %c0_4 = arith.constant 0 : index
    %c0_5 = arith.constant 0 : index
    %c0_6 = arith.constant 0 : index
    %5 = vector.load %arg2[%c0_4, %c0_5, %c0_6] : memref<9x8x4xf32, #tpu.memory_space<vmem>>, vector<1x8x4xf32>
    %6 = vector.shape_cast %5 : vector<1x8x4xf32> to vector<8x4xf32>
    %cst = arith.constant dense<0.000000e+00> : vector<8x288xf32>
    %7 = tpu.matmul %6, %4, %cst {dimension_numbers = #tpu.dot_dimension_numbers<[1], [0], [0], [1], [0, 0, 1, 1], [], []>} : vector<8x4xf32>, vector<4x288xf32>, vector<8x288xf32> -> vector<8x288xf32>
    %8 = arith.addf %2, %7 : vector<8x288xf32>
    %c0_7 = arith.constant 0 : index
    %c0_8 = arith.constant 0 : index
    %c1 = arith.constant 1 : index
    %9 = vector.load %arg1[%c0_7, %c0_8, %c1] : memref<1x4x342xf32, #tpu.memory_space<vmem>>, vector<1x4x288xf32>
    %10 = vector.shape_cast %9 : vector<1x4x288xf32> to vector<4x288xf32>
    %c1_9 = arith.constant 1 : index
    %c0_10 = arith.constant 0 : index
    %c0_11 = arith.constant 0 : index
    %11 = vector.load %arg2[%c1_9, %c0_10, %c0_11] : memref<9x8x4xf32, #tpu.memory_space<vmem>>, vector<1x8x4xf32>
    %12 = vector.shape_cast %11 : vector<1x8x4xf32> to vector<8x4xf32>
    %cst_12 = arith.constant dense<0.000000e+00> : vector<8x288xf32>
    %13 = tpu.matmul %12, %10, %cst_12 {dimension_numbers = #tpu.dot_dimension_numbers<[1], [0], [0], [1], [0, 0, 1, 1], [], []>} : vector<8x4xf32>, vector<4x288xf32>, vector<8x288xf32> -> vector<8x288xf32>
    %14 = arith.addf %8, %13 : vector<8x288xf32>
    %c0_13 = arith.constant 0 : index
    %c0_14 = arith.constant 0 : index
    %c2 = arith.constant 2 : index
    %15 = vector.load %arg1[%c0_13, %c0_14, %c2] : memref<1x4x342xf32, #tpu.memory_space<vmem>>, vector<1x4x288xf32>
    %16 = vector.shape_cast %15 : vector<1x4x288xf32> to vector<4x288xf32>
    %c2_15 = arith.constant 2 : index
    %c0_16 = arith.constant 0 : index
    %c0_17 = arith.constant 0 : index
    %17 = vector.load %arg2[%c2_15, %c0_16, %c0_17] : memref<9x8x4xf32, #tpu.memory_space<vmem>>, vector<1x8x4xf32>
    %18 = vector.shape_cast %17 : vector<1x8x4xf32> to vector<8x4xf32>
    %cst_18 = arith.constant dense<0.000000e+00> : vector<8x288xf32>
    %19 = tpu.matmul %18, %16, %cst_18 {dimension_numbers = #tpu.dot_dimension_numbers<[1], [0], [0], [1], [0, 0, 1, 1], [], []>} : vector<8x4xf32>, vector<4x288xf32>, vector<8x288xf32> -> vector<8x288xf32>
    %20 = arith.addf %14, %19 : vector<8x288xf32>
    %c0_19 = arith.constant 0 : index
    %c0_20 = arith.constant 0 : index
    %c18 = arith.constant 18 : index
    %21 = vector.load %arg1[%c0_19, %c0_20, %c18] : memref<1x4x342xf32, #tpu.memory_space<vmem>>, vector<1x4x288xf32>
    %22 = vector.shape_cast %21 : vector<1x4x288xf32> to vector<4x288xf32>
    %c3 = arith.constant 3 : index
    %c0_21 = arith.constant 0 : index
    %c0_22 = arith.constant 0 : index
    %23 = vector.load %arg2[%c3, %c0_21, %c0_22] : memref<9x8x4xf32, #tpu.memory_space<vmem>>, vector<1x8x4xf32>
    %24 = vector.shape_cast %23 : vector<1x8x4xf32> to vector<8x4xf32>
    %cst_23 = arith.constant dense<0.000000e+00> : vector<8x288xf32>
    %25 = tpu.matmul %24, %22, %cst_23 {dimension_numbers = #tpu.dot_dimension_numbers<[1], [0], [0], [1], [0, 0, 1, 1], [], []>} : vector<8x4xf32>, vector<4x288xf32>, vector<8x288xf32> -> vector<8x288xf32>
    %26 = arith.addf %20, %25 : vector<8x288xf32>
    %c0_24 = arith.constant 0 : index
    %c0_25 = arith.constant 0 : index
    %c19 = arith.constant 19 : index
    %27 = vector.load %arg1[%c0_24, %c0_25, %c19] : memref<1x4x342xf32, #tpu.memory_space<vmem>>, vector<1x4x288xf32>
    %28 = vector.shape_cast %27 : vector<1x4x288xf32> to vector<4x288xf32>
    %c4 = arith.constant 4 : index
    %c0_26 = arith.constant 0 : index
    %c0_27 = arith.constant 0 : index
    %29 = vector.load %arg2[%c4, %c0_26, %c0_27] : memref<9x8x4xf32, #tpu.memory_space<vmem>>, vector<1x8x4xf32>
    %30 = vector.shape_cast %29 : vector<1x8x4xf32> to vector<8x4xf32>
    %cst_28 = arith.constant dense<0.000000e+00> : vector<8x288xf32>
    %31 = tpu.matmul %30, %28, %cst_28 {dimension_numbers = #tpu.dot_dimension_numbers<[1], [0], [0], [1], [0, 0, 1, 1], [], []>} : vector<8x4xf32>, vector<4x288xf32>, vector<8x288xf32> -> vector<8x288xf32>
    %32 = arith.addf %26, %31 : vector<8x288xf32>
    %c0_29 = arith.constant 0 : index
    %c0_30 = arith.constant 0 : index
    %c20 = arith.constant 20 : index
    %33 = vector.load %arg1[%c0_29, %c0_30, %c20] : memref<1x4x342xf32, #tpu.memory_space<vmem>>, vector<1x4x288xf32>
    %34 = vector.shape_cast %33 : vector<1x4x288xf32> to vector<4x288xf32>
    %c5 = arith.constant 5 : index
    %c0_31 = arith.constant 0 : index
    %c0_32 = arith.constant 0 : index
    %35 = vector.load %arg2[%c5, %c0_31, %c0_32] : memref<9x8x4xf32, #tpu.memory_space<vmem>>, vector<1x8x4xf32>
    %36 = vector.shape_cast %35 : vector<1x8x4xf32> to vector<8x4xf32>
    %cst_33 = arith.constant dense<0.000000e+00> : vector<8x288xf32>
    %37 = tpu.matmul %36, %34, %cst_33 {dimension_numbers = #tpu.dot_dimension_numbers<[1], [0], [0], [1], [0, 0, 1, 1], [], []>} : vector<8x4xf32>, vector<4x288xf32>, vector<8x288xf32> -> vector<8x288xf32>
    %38 = arith.addf %32, %37 : vector<8x288xf32>
    %c0_34 = arith.constant 0 : index
    %c0_35 = arith.constant 0 : index
    %c36 = arith.constant 36 : index
    %39 = vector.load %arg1[%c0_34, %c0_35, %c36] : memref<1x4x342xf32, #tpu.memory_space<vmem>>, vector<1x4x288xf32>
    %40 = vector.shape_cast %39 : vector<1x4x288xf32> to vector<4x288xf32>
    %c6 = arith.constant 6 : index
    %c0_36 = arith.constant 0 : index
    %c0_37 = arith.constant 0 : index
    %41 = vector.load %arg2[%c6, %c0_36, %c0_37] : memref<9x8x4xf32, #tpu.memory_space<vmem>>, vector<1x8x4xf32>
    %42 = vector.shape_cast %41 : vector<1x8x4xf32> to vector<8x4xf32>
    %cst_38 = arith.constant dense<0.000000e+00> : vector<8x288xf32>
    %43 = tpu.matmul %42, %40, %cst_38 {dimension_numbers = #tpu.dot_dimension_numbers<[1], [0], [0], [1], [0, 0, 1, 1], [], []>} : vector<8x4xf32>, vector<4x288xf32>, vector<8x288xf32> -> vector<8x288xf32>
    %44 = arith.addf %38, %43 : vector<8x288xf32>
    %c0_39 = arith.constant 0 : index
    %c0_40 = arith.constant 0 : index
    %c37 = arith.constant 37 : index
    %45 = vector.load %arg1[%c0_39, %c0_40, %c37] : memref<1x4x342xf32, #tpu.memory_space<vmem>>, vector<1x4x288xf32>
    %46 = vector.shape_cast %45 : vector<1x4x288xf32> to vector<4x288xf32>
    %c7 = arith.constant 7 : index
    %c0_41 = arith.constant 0 : index
    %c0_42 = arith.constant 0 : index
    %47 = vector.load %arg2[%c7, %c0_41, %c0_42] : memref<9x8x4xf32, #tpu.memory_space<vmem>>, vector<1x8x4xf32>
    %48 = vector.shape_cast %47 : vector<1x8x4xf32> to vector<8x4xf32>
    %cst_43 = arith.constant dense<0.000000e+00> : vector<8x288xf32>
    %49 = tpu.matmul %48, %46, %cst_43 {dimension_numbers = #tpu.dot_dimension_numbers<[1], [0], [0], [1], [0, 0, 1, 1], [], []>} : vector<8x4xf32>, vector<4x288xf32>, vector<8x288xf32> -> vector<8x288xf32>
    %50 = arith.addf %44, %49 : vector<8x288xf32>
    %c0_44 = arith.constant 0 : index
    %c0_45 = arith.constant 0 : index
    %c38 = arith.constant 38 : index
    %51 = vector.load %arg1[%c0_44, %c0_45, %c38] : memref<1x4x342xf32, #tpu.memory_space<vmem>>, vector<1x4x288xf32>
    %52 = vector.shape_cast %51 : vector<1x4x288xf32> to vector<4x288xf32>
    %c8 = arith.constant 8 : index
    %c0_46 = arith.constant 0 : index
    %c0_47 = arith.constant 0 : index
    %53 = vector.load %arg2[%c8, %c0_46, %c0_47] : memref<9x8x4xf32, #tpu.memory_space<vmem>>, vector<1x8x4xf32>
    %54 = vector.shape_cast %53 : vector<1x8x4xf32> to vector<8x4xf32>
    %cst_48 = arith.constant dense<0.000000e+00> : vector<8x288xf32>
    %55 = tpu.matmul %54, %52, %cst_48 {dimension_numbers = #tpu.dot_dimension_numbers<[1], [0], [0], [1], [0, 0, 1, 1], [], []>} : vector<8x4xf32>, vector<4x288xf32>, vector<8x288xf32> -> vector<8x288xf32>
    %56 = arith.addf %50, %55 : vector<8x288xf32>
    %cst_49 = arith.constant 0.000000e+00 : f32
    %57 = vector.broadcast %cst_49 : f32 to vector<8x288xf32>
    %58 = arith.maximumf %56, %57 : vector<8x288xf32>
    %c0_50 = arith.constant 0 : index
    %c0_51 = arith.constant 0 : index
    %59 = vector.load %arg6[%c0_50, %c0_51] : memref<1x288xf32, #tpu.memory_space<vmem>>, vector<1x288xf32>
    %60 = vector.broadcast %59 : vector<1x288xf32> to vector<8x288xf32>
    %61 = arith.mulf %58, %60 : vector<8x288xf32>
    %cst_52 = arith.constant 0.000000e+00 : f32
    %62 = vector.broadcast %cst_52 : f32 to vector<8x324xf32>
    %c0_53 = arith.constant 0 : index
    %c0_54 = arith.constant 0 : index
    %63 = vector.load %arg8[%c0_53, %c0_54] : memref<8x324xf32, #tpu.memory_space<vmem>>, vector<8x324xf32>
    tpu.vector_store %arg8[%c0_53, %c0_54], %62 {strides = array<i32>} : memref<8x324xf32, #tpu.memory_space<vmem>>, vector<8x324xf32>,
    %c0_55 = arith.constant 0 : index
    %c0_56 = arith.constant 0 : index
    %64 = vector.load %arg8[%c0_55, %c0_56] : memref<8x324xf32, #tpu.memory_space<vmem>>, vector<8x288xf32>
    tpu.vector_store %arg8[%c0_55, %c0_56], %61 {strides = array<i32>} : memref<8x324xf32, #tpu.memory_space<vmem>>, vector<8x288xf32>,
    %c0_57 = arith.constant 0 : index
    %c0_58 = arith.constant 0 : index
    %65 = vector.load %arg5[%c0_57, %c0_58] : memref<4x1xf32, #tpu.memory_space<vmem>>, vector<4x1xf32>
    %c4_59 = arith.constant 4 : index
    %c0_60 = arith.constant 0 : index
    %c0_61 = arith.constant 0 : index
    %66 = vector.load %arg4[%c4_59, %c0_60, %c0_61] : memref<9x4x8xf32, #tpu.memory_space<vmem>>, vector<1x4x8xf32>
    %67 = vector.shape_cast %66 : vector<1x4x8xf32> to vector<4x8xf32>
    %c0_62 = arith.constant 0 : index
    %c0_63 = arith.constant 0 : index
    %68 = vector.load %arg8[%c0_62, %c0_63] : memref<8x324xf32, #tpu.memory_space<vmem>>, vector<8x288xf32>
    %cst_64 = arith.constant dense<0.000000e+00> : vector<4x288xf32>
    %69 = tpu.matmul %67, %68, %cst_64 {dimension_numbers = #tpu.dot_dimension_numbers<[1], [0], [0], [1], [0, 0, 1, 1], [], []>} : vector<4x8xf32>, vector<8x288xf32>, vector<4x288xf32> -> vector<4x288xf32>
    %70 = vector.broadcast %65 : vector<4x1xf32> to vector<4x288xf32>
    %71 = arith.addf %70, %69 : vector<4x288xf32>
    %c3_65 = arith.constant 3 : index
    %c0_66 = arith.constant 0 : index
    %c0_67 = arith.constant 0 : index
    %72 = vector.load %arg4[%c3_65, %c0_66, %c0_67] : memref<9x4x8xf32, #tpu.memory_space<vmem>>, vector<1x4x8xf32>
    %73 = vector.shape_cast %72 : vector<1x4x8xf32> to vector<4x8xf32>
    %c0_68 = arith.constant 0 : index
    %c1_69 = arith.constant 1 : index
    %74 = vector.load %arg8[%c0_68, %c1_69] : memref<8x324xf32, #tpu.memory_space<vmem>>, vector<8x288xf32>
    %cst_70 = arith.constant dense<0.000000e+00> : vector<4x288xf32>
    %75 = tpu.matmul %73, %74, %cst_70 {dimension_numbers = #tpu.dot_dimension_numbers<[1], [0], [0], [1], [0, 0, 1, 1], [], []>} : vector<4x8xf32>, vector<8x288xf32>, vector<4x288xf32> -> vector<4x288xf32>
    %76 = vector.broadcast %65 : vector<4x1xf32> to vector<4x288xf32>
    %77 = arith.addf %76, %75 : vector<4x288xf32>
    %c5_71 = arith.constant 5 : index
    %c0_72 = arith.constant 0 : index
    %c0_73 = arith.constant 0 : index
    %78 = vector.load %arg4[%c5_71, %c0_72, %c0_73] : memref<9x4x8xf32, #tpu.memory_space<vmem>>, vector<1x4x8xf32>
    %79 = vector.shape_cast %78 : vector<1x4x8xf32> to vector<4x8xf32>
    %c0_74 = arith.constant 0 : index
    %c0_75 = arith.constant 0 : index
    %80 = vector.load %arg8[%c0_74, %c0_75] : memref<8x324xf32, #tpu.memory_space<vmem>>, vector<8x288xf32>
    %cst_76 = arith.constant dense<0.000000e+00> : vector<4x288xf32>
    %81 = tpu.matmul %79, %80, %cst_76 {dimension_numbers = #tpu.dot_dimension_numbers<[1], [0], [0], [1], [0, 0, 1, 1], [], []>} : vector<4x8xf32>, vector<8x288xf32>, vector<4x288xf32> -> vector<4x288xf32>
    %82 = arith.addf %77, %81 : vector<4x288xf32>
    %c1_77 = arith.constant 1 : index
    %c0_78 = arith.constant 0 : index
    %c0_79 = arith.constant 0 : index
    %83 = vector.load %arg4[%c1_77, %c0_78, %c0_79] : memref<9x4x8xf32, #tpu.memory_space<vmem>>, vector<1x4x8xf32>
    %84 = vector.shape_cast %83 : vector<1x4x8xf32> to vector<4x8xf32>
    %c0_80 = arith.constant 0 : index
    %c18_81 = arith.constant 18 : index
    %85 = vector.load %arg8[%c0_80, %c18_81] : memref<8x324xf32, #tpu.memory_space<vmem>>, vector<8x288xf32>
    %cst_82 = arith.constant dense<0.000000e+00> : vector<4x288xf32>
    %86 = tpu.matmul %84, %85, %cst_82 {dimension_numbers = #tpu.dot_dimension_numbers<[1], [0], [0], [1], [0, 0, 1, 1], [], []>} : vector<4x8xf32>, vector<8x288xf32>, vector<4x288xf32> -> vector<4x288xf32>
    %87 = vector.broadcast %65 : vector<4x1xf32> to vector<4x288xf32>
    %88 = arith.addf %87, %86 : vector<4x288xf32>
    %c7_83 = arith.constant 7 : index
    %c0_84 = arith.constant 0 : index
    %c0_85 = arith.constant 0 : index
    %89 = vector.load %arg4[%c7_83, %c0_84, %c0_85] : memref<9x4x8xf32, #tpu.memory_space<vmem>>, vector<1x4x8xf32>
    %90 = vector.shape_cast %89 : vector<1x4x8xf32> to vector<4x8xf32>
    %c0_86 = arith.constant 0 : index
    %c0_87 = arith.constant 0 : index
    %91 = vector.load %arg8[%c0_86, %c0_87] : memref<8x324xf32, #tpu.memory_space<vmem>>, vector<8x288xf32>
    %cst_88 = arith.constant dense<0.000000e+00> : vector<4x288xf32>
    %92 = tpu.matmul %90, %91, %cst_88 {dimension_numbers = #tpu.dot_dimension_numbers<[1], [0], [0], [1], [0, 0, 1, 1], [], []>} : vector<4x8xf32>, vector<8x288xf32>, vector<4x288xf32> -> vector<4x288xf32>
    %93 = arith.addf %88, %92 : vector<4x288xf32>
    %c0_89 = arith.constant 0 : index
    %c0_90 = arith.constant 0 : index
    %c0_91 = arith.constant 0 : index
    %94 = vector.load %arg4[%c0_89, %c0_90, %c0_91] : memref<9x4x8xf32, #tpu.memory_space<vmem>>, vector<1x4x8xf32>
    %95 = vector.shape_cast %94 : vector<1x4x8xf32> to vector<4x8xf32>
    %c0_92 = arith.constant 0 : index
    %c19_93 = arith.constant 19 : index
    %96 = vector.load %arg8[%c0_92, %c19_93] : memref<8x324xf32, #tpu.memory_space<vmem>>, vector<8x288xf32>
    %cst_94 = arith.constant dense<0.000000e+00> : vector<4x288xf32>
    %97 = tpu.matmul %95, %96, %cst_94 {dimension_numbers = #tpu.dot_dimension_numbers<[1], [0], [0], [1], [0, 0, 1, 1], [], []>} : vector<4x8xf32>, vector<8x288xf32>, vector<4x288xf32> -> vector<4x288xf32>
    %98 = vector.broadcast %65 : vector<4x1xf32> to vector<4x288xf32>
    %99 = arith.addf %98, %97 : vector<4x288xf32>
    %c2_95 = arith.constant 2 : index
    %c0_96 = arith.constant 0 : index
    %c0_97 = arith.constant 0 : index
    %100 = vector.load %arg4[%c2_95, %c0_96, %c0_97] : memref<9x4x8xf32, #tpu.memory_space<vmem>>, vector<1x4x8xf32>
    %101 = vector.shape_cast %100 : vector<1x4x8xf32> to vector<4x8xf32>
    %c0_98 = arith.constant 0 : index
    %c18_99 = arith.constant 18 : index
    %102 = vector.load %arg8[%c0_98, %c18_99] : memref<8x324xf32, #tpu.memory_space<vmem>>, vector<8x288xf32>
    %cst_100 = arith.constant dense<0.000000e+00> : vector<4x288xf32>
    %103 = tpu.matmul %101, %102, %cst_100 {dimension_numbers = #tpu.dot_dimension_numbers<[1], [0], [0], [1], [0, 0, 1, 1], [], []>} : vector<4x8xf32>, vector<8x288xf32>, vector<4x288xf32> -> vector<4x288xf32>
    %104 = arith.addf %99, %103 : vector<4x288xf32>
    %c6_101 = arith.constant 6 : index
    %c0_102 = arith.constant 0 : index
    %c0_103 = arith.constant 0 : index
    %105 = vector.load %arg4[%c6_101, %c0_102, %c0_103] : memref<9x4x8xf32, #tpu.memory_space<vmem>>, vector<1x4x8xf32>
    %106 = vector.shape_cast %105 : vector<1x4x8xf32> to vector<4x8xf32>
    %c0_104 = arith.constant 0 : index
    %c1_105 = arith.constant 1 : index
    %107 = vector.load %arg8[%c0_104, %c1_105] : memref<8x324xf32, #tpu.memory_space<vmem>>, vector<8x288xf32>
    %cst_106 = arith.constant dense<0.000000e+00> : vector<4x288xf32>
    %108 = tpu.matmul %106, %107, %cst_106 {dimension_numbers = #tpu.dot_dimension_numbers<[1], [0], [0], [1], [0, 0, 1, 1], [], []>} : vector<4x8xf32>, vector<8x288xf32>, vector<4x288xf32> -> vector<4x288xf32>
    %109 = arith.addf %104, %108 : vector<4x288xf32>
    %c8_107 = arith.constant 8 : index
    %c0_108 = arith.constant 0 : index
    %c0_109 = arith.constant 0 : index
    %110 = vector.load %arg4[%c8_107, %c0_108, %c0_109] : memref<9x4x8xf32, #tpu.memory_space<vmem>>, vector<1x4x8xf32>
    %111 = vector.shape_cast %110 : vector<1x4x8xf32> to vector<4x8xf32>
    %c0_110 = arith.constant 0 : index
    %c0_111 = arith.constant 0 : index
    %112 = vector.load %arg8[%c0_110, %c0_111] : memref<8x324xf32, #tpu.memory_space<vmem>>, vector<8x288xf32>
    %cst_112 = arith.constant dense<0.000000e+00> : vector<4x288xf32>
    %113 = tpu.matmul %111, %112, %cst_112 {dimension_numbers = #tpu.dot_dimension_numbers<[1], [0], [0], [1], [0, 0, 1, 1], [], []>} : vector<4x8xf32>, vector<8x288xf32>, vector<4x288xf32> -> vector<4x288xf32>
    %114 = arith.addf %109, %113 : vector<4x288xf32>
    %cst_113 = arith.constant 0.000000e+00 : f32
    %115 = vector.broadcast %cst_113 : f32 to vector<4x288xf32>
    %116 = arith.maximumf %71, %115 : vector<4x288xf32>
    %c0_114 = arith.constant 0 : index
    %c0_115 = arith.constant 0 : index
    %c0_116 = arith.constant 0 : index
    %c0_117 = arith.constant 0 : index
    %117 = vector.load %arg7[%c0_114, %c0_115, %c0_116, %c0_117] : memref<1x4x4x288xf32, #tpu.memory_space<vmem>>, vector<1x1x4x288xf32>
    %118 = vector.shape_cast %117 : vector<1x1x4x288xf32> to vector<4x288xf32>
    %119 = vector.shape_cast %116 : vector<4x288xf32> to vector<1x1x4x288xf32>
    tpu.vector_store %arg7[%c0_114, %c0_115, %c0_116, %c0_117], %119 {strides = array<i32>} : memref<1x4x4x288xf32, #tpu.memory_space<vmem>>, vector<1x1x4x288xf32>,
    %cst_118 = arith.constant 0.000000e+00 : f32
    %120 = vector.broadcast %cst_118 : f32 to vector<4x288xf32>
    %121 = arith.maximumf %82, %120 : vector<4x288xf32>
    %c0_119 = arith.constant 0 : index
    %c1_120 = arith.constant 1 : index
    %c0_121 = arith.constant 0 : index
    %c0_122 = arith.constant 0 : index
    %122 = vector.load %arg7[%c0_119, %c1_120, %c0_121, %c0_122] : memref<1x4x4x288xf32, #tpu.memory_space<vmem>>, vector<1x1x4x288xf32>
    %123 = vector.shape_cast %122 : vector<1x1x4x288xf32> to vector<4x288xf32>
    %124 = vector.shape_cast %121 : vector<4x288xf32> to vector<1x1x4x288xf32>
    tpu.vector_store %arg7[%c0_119, %c1_120, %c0_121, %c0_122], %124 {strides = array<i32>} : memref<1x4x4x288xf32, #tpu.memory_space<vmem>>, vector<1x1x4x288xf32>,
    %cst_123 = arith.constant 0.000000e+00 : f32
    %125 = vector.broadcast %cst_123 : f32 to vector<4x288xf32>
    %126 = arith.maximumf %93, %125 : vector<4x288xf32>
    %c0_124 = arith.constant 0 : index
    %c2_125 = arith.constant 2 : index
    %c0_126 = arith.constant 0 : index
    %c0_127 = arith.constant 0 : index
    %127 = vector.load %arg7[%c0_124, %c2_125, %c0_126, %c0_127] : memref<1x4x4x288xf32, #tpu.memory_space<vmem>>, vector<1x1x4x288xf32>
    %128 = vector.shape_cast %127 : vector<1x1x4x288xf32> to vector<4x288xf32>
    %129 = vector.shape_cast %126 : vector<4x288xf32> to vector<1x1x4x288xf32>
    tpu.vector_store %arg7[%c0_124, %c2_125, %c0_126, %c0_127], %129 {strides = array<i32>} : memref<1x4x4x288xf32, #tpu.memory_space<vmem>>, vector<1x1x4x288xf32>,
    %cst_128 = arith.constant 0.000000e+00 : f32
    %130 = vector.broadcast %cst_128 : f32 to vector<4x288xf32>
    %131 = arith.maximumf %114, %130 : vector<4x288xf32>
    %c0_129 = arith.constant 0 : index
    %c3_130 = arith.constant 3 : index
    %c0_131 = arith.constant 0 : index
    %c0_132 = arith.constant 0 : index
    %132 = vector.load %arg7[%c0_129, %c3_130, %c0_131, %c0_132] : memref<1x4x4x288xf32, #tpu.memory_space<vmem>>, vector<1x1x4x288xf32>
    %133 = vector.shape_cast %132 : vector<1x1x4x288xf32> to vector<4x288xf32>
    %134 = vector.shape_cast %131 : vector<4x288xf32> to vector<1x1x4x288xf32>
    tpu.vector_store %arg7[%c0_129, %c3_130, %c0_131, %c0_132], %134 {strides = array<i32>} : memref<1x4x4x288xf32, #tpu.memory_space<vmem>>, vector<1x1x4x288xf32>,
    return
  }
  func.func @transform_0(%arg0: i32) -> (i32, i32, i32) {
    %c0_i32 = arith.constant 0 : i32
    %c0_i32_0 = arith.constant 0 : i32
    %c0_i32_1 = arith.constant 0 : i32
    return %arg0, %c0_i32, %c0_i32_0 : i32, i32, i32
  }
  func.func @transform_1(%arg0: i32) -> (i32, i32, i32) {
    %c0_i32 = arith.constant 0 : i32
    %c0_i32_0 = arith.constant 0 : i32
    %c0_i32_1 = arith.constant 0 : i32
    %c0_i32_2 = arith.constant 0 : i32
    return %c0_i32, %c0_i32_0, %c0_i32_1 : i32, i32, i32
  }
  func.func @transform_2(%arg0: i32) -> (i32, i32) {
    %c0_i32 = arith.constant 0 : i32
    %c0_i32_0 = arith.constant 0 : i32
    %c0_i32_1 = arith.constant 0 : i32
    return %c0_i32, %c0_i32_0 : i32, i32
  }
  func.func @transform_3(%arg0: i32) -> (i32, i32, i32) {
    %c0_i32 = arith.constant 0 : i32
    %c0_i32_0 = arith.constant 0 : i32
    %c0_i32_1 = arith.constant 0 : i32
    %c0_i32_2 = arith.constant 0 : i32
    return %c0_i32, %c0_i32_0, %c0_i32_1 : i32, i32, i32
  }
  func.func @transform_4(%arg0: i32) -> (i32, i32) {
    %c0_i32 = arith.constant 0 : i32
    %c0_i32_0 = arith.constant 0 : i32
    %c0_i32_1 = arith.constant 0 : i32
    return %c0_i32, %c0_i32_0 : i32, i32
  }
  func.func @transform_5(%arg0: i32) -> (i32, i32) {
    %c0_i32 = arith.constant 0 : i32
    %c0_i32_0 = arith.constant 0 : i32
    %c0_i32_1 = arith.constant 0 : i32
    return %c0_i32, %c0_i32_0 : i32, i32
  }
  func.func @transform_6(%arg0: i32) -> (i32, i32, i32, i32) {
    %c0_i32 = arith.constant 0 : i32
    %c0_i32_0 = arith.constant 0 : i32
    %c0_i32_1 = arith.constant 0 : i32
    %c0_i32_2 = arith.constant 0 : i32
    return %arg0, %c0_i32, %c0_i32_0, %c0_i32_1 : i32, i32, i32, i32
  }
}

</mosaic_0001>

<bundles_post_ra>
// kernel: tpu_custom_call.1
= control target key start
LH: loop header
LB: loop body
LE: loop exit
PB: predicated region body
PF: predicated region fallthrough
CT: control target
= control target key end

     0   :  { %11 = vsyncpa [#allocation4], 0  ;;  %s4106_s0 = inlined_call_operand.vmem [shape: f32[2,4,342], index: 0, kind: input, shape index: {}]   ;;  %s4107_s1 = inlined_call_operand.vmem [shape: f32[9,8,4], index: 1, kind: input, shape index: {}]   ;;  %s4108_s2 = inlined_call_operand.vmem [shape: f32[8,1], index: 2, kind: input, shape index: {}]   ;;  %s4109_s3 = inlined_call_operand.vmem [shape: f32[9,4,8], index: 3, kind: input, shape index: {}]   ;;  %s4110_s4 = inlined_call_operand.vmem [shape: f32[4,1], index: 4, kind: input, shape index: {}]   ;;  %s4111_s5 = inlined_call_operand.vmem [shape: f32[1,288], index: 5, kind: input, shape index: {}]   ;;  %s4112_s6 = inlined_call_operand.hbm [shape: f32[2,4,4,288], index: 6, kind: output, shape index: {}]  }
   0x1   :  { %13 = vsyncpa [#allocation4 + $0x1], 0  ;;  %s3690_s21 = smov 0   ;;  %s3692_s22 = smov 0  }
   0x2   :  { %s3694_s23 = smov 0   ;;  %s3696_s24 = smov 0  }
   0x3 LB: > { %s3711_s25 = sadd.s32 4294967295, %s3639_s24   ;;  %s3302_s26 = sadd.s32 4294967294, %s3639_s24   ;;  %s3639_s24 = sphi %s3696_s24, %s4118_s24   ;;  %s3635_s23 = sphi %s3694_s23, %s4117_s23   ;;  %s3631_s22 = sphi %s3692_s22, %s4116_s22   ;;  %s3627_s21 = sphi %s3690_s21, %s4115_s21  }
   0x4   : > { %s3715_s27 = sadd.s32 1, %s3639_s24   ;;  %s157_s28 = sadd.s32 1, %s3635_s23 }
   0x5   : > { %s154_s29 = ssub.s32 %s3639_s24, %s3715_s27  ;;  %p167_p0 = scmp.ne.s32.totalorder %s3635_s23, %s3631_s22 }
   0x6   : > { %p155_p1 = scmp.eq.s32.totalorder %s154_s29, 0  ;;  %p168_p2 = scmp.eq.s32.totalorder %s3711_s25, 1 }
   0x7   : > { %p173_p3 = scmp.ne.s32.totalorder %s3631_s22, %s3627_s21  ;;  %p174_p4 = scmp.eq.s32.totalorder %s3302_s26, 1 }
   0x8   : > { %s3726_s30 = scalar_select %p155_p1, %s3635_s23, %s157_s28  }
   0x9   : > { %p3728_p5 = por %p168_p2, %p167_p0  ;;  %p3732_p6 = por %p174_p4, %p173_p3 }
   0xa   : > { %p3305_p7 = scmp.ge.s32.totalorder %s3639_s24, 1  ;;  %p215_p8 = scmp.lt.s32.totalorder %s3639_s24, 3 }
   0xc   : > { %p216_p9 = pnand %p3305_p7, %p215_p8 }
   0xd   : > { %p245_p10 = scmp.lt.s32.totalorder (!%p216_p9), %s3711_s25, 1  ;;  %s3643_s14 = smov (!%p216_p9), 127  }
   0xe   : > { %219 = sbr.rel (%p216_p9) target bundleno = 755 (0x2f3), region = 44  ;;  %s3644_s17 = smov (!%p216_p9), 126  }
   0xf   : > { %s3645_s18 = smov (!%p216_p9), 110   ;;  %s3646_s19 = smov (!%p216_p9), 109  }
  0x10   : > { %s3647_s20 = smov (!%p216_p9), 108   ;;  %s3648_s26 = smov (!%p216_p9), 92  }
  0x11   : > { %s3650_s28 = smov (!%p216_p9), 91   ;;  %s3651_s29 = smov (!%p216_p9), 90  }
  0x13   : > { %v3641_v0 = vmov 0.0   ;;  %vm3642_vm0 = vmmov 0   ;;  %s246_s9 = scalar_select %p245_p10, %s3711_s25, 1  ;;  %vm266_vm1 = vcmask 1043456   ;;  %v258_v6 = vld [vmem:[%s4107_s1] sm:$0xff]  ;;  %vm262_vm2 = vcmask 31744  }
  0x14   : > { %3431 = vmatprep.subr.mxu1 %v3641_v0  ;;  %3433 = vmatprep.mubr.msk.f32.mxu1 %vm3642_vm0, %v3641_v0  ;;  %v3649_v12 = vmov 0   ;;  %v250_v14 = vld [vmem:[%s4108_s2] sm:$0xff]  ;;  %v3312_v15 = vld [vmem:[%s4107_s1 + $0x8] sm:$0xff]  ;;  %v3318_v18 = vld [vmem:[%s4107_s1 + $0x10] sm:$0xff]  ;;  %vm430_vm3 = vcmask 1039360   ;;  %vm599_vm4 = vcmask 1031168  }
  0x15   : > { %337 = vmatprep.mubr.f32.mxu0 %v3641_v0  ;;  %s3522_s10 = smul.u32 12, %s246_s9  ;;  %3576 = vset.pattern.permute.xlu0 %v3649_v12  ;;  %vm768_vm5 = vcmask 900096   ;;  %v3324_v29 = vld [vmem:[%s4107_s1 + $0x18] sm:$0xff]  ;;  %vm937_vm6 = vcmask 891904   ;;  %v3330_v36 = vld [vmem:[%s4107_s1 + $0x20] sm:$0xff]  ;;  %vm1106_vm7 = vcmask 883712  }
  0x16   : > { %3577 = vset.pattern.permute.xlu1 %v3649_v12  ;;  %v3336_v41 = vld [vmem:[%s4107_s1 + $0x28] sm:$0xff]  ;;  %vm1275_vm8 = vcmask 752640   ;;  %v3342_v46 = vld [vmem:[%s4107_s1 + $0x30] sm:$0xff]  ;;  %vm1444_vm9 = vcmask 744448   ;;  %v3348_v51 = vld [vmem:[%s4107_s1 + $0x38] sm:$0xff]  ;;  %vm1613_vm10 = vcmask 736256  }
  0x17   : > { %s3747_s13 = scalar_lea.vmem %s4106_s0, %s3522_s10  ;;  %v3354_v58 = vld [vmem:[%s4107_s1 + $0x40] sm:$0xff]  ;;  %vm1794_vm11 = vcmask 556032   ;;  %vm1798_vm12 = vcmask 261120   ;;  %vm1806_vm13 = vcmask 64512   ;;  %s242_s9 = sand.u32 1, %s3631_s22   ;;  %vm3194_vm14 = vcmask 257024  }
  0x18   : > { %v418_v1 = vld [vmem:[%s3747_s13 + $0x8] sm:$0xf]  ;;  %v417_v2 = vld [vmem:[%s3747_s13] sm:$0xff]  ;;  %1795 = vst.msk [vmem:[#allocation2 + $0x10] sm:$0xff] %vm1794_vm11, %v3641_v0  ;;  %s3523_s10 = smul.u32 768, %s3711_s25  ;;  %s4066_s25 = scalar_lea.sflag [#allocation4], %s242_s9 }
  0x19   : > { %428 = vrot.lane.b32.xlu0 %v418_v1, %s3643_s14  ;;  %424 = vrot.lane.b32.xlu1 %v417_v2, %s3643_s14  ;;  %v423_v3 = vcombine.high %v417_v2, %v417_v2  ;;  %v587_v4 = vld [vmem:[%s3747_s13 + $0x8] sm:$0xf] }
  0x1a   : > { %v257_v5 = vld [vmem:[%s3747_s13 + $0x8] sm:$0xf]  ;;  %s4059_s15 = scalar_lea.hbm %s4112_s6, %s3523_s10 }
  0x1b   : > { %3307 = vmatprep.subr.msk.mxu0 %vm266_vm1, %v423_v3  ;;  %3432 = vmatpush3.msk.msra.mxu1 %vm266_vm1, %v257_v5  ;;  %v756_v7 = vld [vmem:[%s3747_s13 + $0x8] sm:$0xf] }
  0x1c   : > { %3308 = vmatpush1.msk.msra.mxu0 %vm266_vm1, %v417_v2  ;;  %3436 = vmatprep.subr.mxu1 %v3641_v0  ;;  %v925_v8 = vld [vmem:[%s3747_s13 + $0x8] sm:$0xf] }
  0x1d   : > { %597 = vrot.lane.b32.xlu0 %v587_v4, %s3644_s17  ;;  %593 = vrot.lane.b32.xlu1 %v417_v2, %s3644_s17  ;;  %v1094_v9 = vld [vmem:[%s3747_s13 + $0x8] sm:$0xf] }
  0x1e   : > { %3434 = vmatmul.mubr.msk.f32.vlgmr.msra.gmra.mxu1 %vm262_vm2, %v258_v6  ;;  %3309 = vmatmul.mubr.msk.f32.vlgmr.msra.gmra.mxu0 %vm262_vm2, %v258_v6  ;;  %v1263_v10 = vld [vmem:[%s3747_s13 + $0x8] sm:$0xf] }
  0x1f   : > { %3438 = vmatprep.mubr.msk.f32.mxu1 %vm3642_vm0, %v3641_v0  ;;  %506 = vmatprep.mubr.f32.mxu0 %v3641_v0  ;;  %v1432_v11 = vld [vmem:[%s3747_s13 + $0x8] sm:$0xf] }
  0x20   : > { %v1601_v13 = vld [vmem:[%s3747_s13 + $0x8] sm:$0xf] }
  0x21   : > { %595 = vrot.lane.b32.xlu1 %v423_v3, %s3644_s17  ;;  %426 = vrot.lane.b32.xlu0 %v423_v3, %s3643_s14  ;;  %s3652_s17 = smov [#allocation3]  }
  0x25   : > { %766 = vrot.lane.b32.xlu1 %v756_v7, %s3645_s18  ;;  %764 = vrot.lane.b32.xlu0 %v423_v3, %s3645_s18 }
  0x29   : > { %933 = vrot.lane.b32.xlu1 %v423_v3, %s3646_s19  ;;  %762 = vrot.lane.b32.xlu0 %v417_v2, %s3645_s18 }
  0x2d   : > { %931 = vrot.lane.b32.xlu1 %v417_v2, %s3646_s19  ;;  %935 = vrot.lane.b32.xlu0 %v925_v8, %s3646_s19 }
  0x31   : > { %1104 = vrot.lane.b32.xlu1 %v1094_v9, %s3647_s20  ;;  %1102 = vrot.lane.b32.xlu0 %v423_v3, %s3647_s20 }
  0x35   : > { %1271 = vrot.lane.b32.xlu1 %v423_v3, %s3648_s26  ;;  %1100 = vrot.lane.b32.xlu0 %v417_v2, %s3647_s20  ;;  %s3583_s20 = sshll.u32 %s3652_s17, 4  ;;  %s3584_s20 = int_to_ptr.vmem [resolvable:$false] %s3583_s20 }
  0x39   : > { %1269 = vrot.lane.b32.xlu1 %v417_v2, %s3648_s26  ;;  %1273 = vrot.lane.b32.xlu0 %v1263_v10, %s3648_s26  ;;  %s3585_s26 = scalar_lea.vmem %s3584_s20, 1536 }
  0x3d   : > { %1442 = vrot.lane.b32.xlu1 %v1432_v11, %s3650_s28  ;;  %1440 = vrot.lane.b32.xlu0 %v423_v3, %s3650_s28 }
  0x41   : > { %1609 = vrot.lane.b32.xlu1 %v423_v3, %s3651_s29  ;;  %1438 = vrot.lane.b32.xlu0 %v417_v2, %s3650_s28 }
  0x45   : > { %1607 = vrot.lane.b32.xlu1 %v417_v2, %s3651_s29  ;;  %1611 = vrot.lane.b32.xlu0 %v1601_v13, %s3651_s29 }
  0x49   : > { %253 = vperm.xlu0 %3576, %v250_v14  }
  0x8b   : > { %v429_v16 = vpop.permute.xlu0 %428  ;;  %v425_v17 = vpop.permute.xlu1 %424 }
  0x8c   : > { %3437 = vmatpush3.msk.msra.mxu1 %vm266_vm1, %v429_v16 }
  0x8d   : > { %3441 = vmatprep.subr.mxu1 %v3641_v0  ;;  %3439 = vmatmul.mubr.msk.f32.vlgmr.msra.gmra.mxu1 %vm262_vm2, %v3312_v15 }
  0x8e   : > { %3443 = vmatprep.mubr.msk.f32.mxu1 %vm3642_vm0, %v3641_v0 }
  0x8f   : > { %v598_v19 = vpop.permute.xlu0 %597  ;;  %v594_v20 = vpop.permute.xlu1 %593 }
  0x90   : > { %3442 = vmatpush3.msk.msra.mxu1 %vm266_vm1, %v598_v19 }
  0x91   : > { %3446 = vmatprep.subr.mxu1 %v3641_v0  ;;  %3444 = vmatmul.mubr.msk.f32.vlgmr.msra.gmra.mxu1 %vm262_vm2, %v3318_v18 }
  0x92   : > { %3448 = vmatprep.mubr.msk.f32.mxu1 %vm3642_vm0, %v3641_v0 }
  0x93   : > { %v596_v21 = vpop.permute.xlu1 %595  ;;  %v427_v22 = vpop.permute.xlu0 %426 }
  0x94   : > { %v431_v23 = vsel %vm430_vm3, %v425_v17, %v427_v22  ;;  %v432_v24 = vsel %vm430_vm3, %v427_v22, %v429_v16  ;;  %v601_v25 = vsel %vm599_vm4, %v596_v21, %v598_v19  ;;  %v600_v26 = vsel %vm599_vm4, %v594_v20, %v596_v21 }
  0x95   : > { %3313 = vmatprep.subr.msk.mxu0 %vm266_vm1, %v432_v24 }
  0x96   : > { %3314 = vmatpush1.msk.msra.mxu0 %vm266_vm1, %v431_v23 }
  0x97   : > { %v767_v27 = vpop.permute.xlu1 %766  ;;  %v765_v28 = vpop.permute.xlu0 %764  ;;  %3315 = vmatmul.mubr.msk.f32.vlgmr.msra.gmra.mxu0 %vm262_vm2, %v3312_v15  ;;  %3319 = vmatprep.subr.msk.mxu0 %vm266_vm1, %v601_v25 }
  0x98   : > { %v770_v30 = vsel %vm768_vm5, %v765_v28, %v767_v27  ;;  %3320 = vmatpush1.msk.msra.mxu0 %vm266_vm1, %v600_v26  ;;  %3447 = vmatpush3.msk.msra.mxu1 %vm266_vm1, %v767_v27 }
  0x99   : > { %3325 = vmatprep.subr.msk.mxu0 %vm266_vm1, %v770_v30  ;;  %675 = vmatprep.mubr.f32.mxu0 %v3641_v0 }
  0x9a   : > { %3451 = vmatprep.subr.mxu1 %v3641_v0  ;;  %3449 = vmatmul.mubr.msk.f32.vlgmr.msra.gmra.mxu1 %vm262_vm2, %v3324_v29 }
  0x9b   : > { %v934_v31 = vpop.permute.xlu1 %933  ;;  %v763_v32 = vpop.permute.xlu0 %762  ;;  %3321 = vmatmul.mubr.msk.f32.vlgmr.msra.gmra.mxu0 %vm262_vm2, %v3318_v18  ;;  %3453 = vmatprep.mubr.msk.f32.mxu1 %vm3642_vm0, %v3641_v0 }
  0x9c   : > { %v769_v33 = vsel %vm768_vm5, %v763_v32, %v765_v28  ;;  %844 = vmatprep.mubr.f32.mxu0 %v3641_v0 }
  0x9d   : > { %3326 = vmatpush1.msk.msra.mxu0 %vm266_vm1, %v769_v33 }
  0x9f   : > { %v932_v34 = vpop.permute.xlu1 %931  ;;  %v936_v35 = vpop.permute.xlu0 %935  ;;  %3327 = vmatmul.mubr.msk.f32.vlgmr.msra.gmra.mxu0 %vm262_vm2, %v3324_v29 }
  0xa0   : > { %v938_v37 = vsel %vm937_vm6, %v932_v34, %v934_v31  ;;  %v939_v38 = vsel %vm937_vm6, %v934_v31, %v936_v35  ;;  %3452 = vmatpush3.msk.msra.mxu1 %vm266_vm1, %v936_v35  ;;  %1013 = vmatprep.mubr.f32.mxu0 %v3641_v0  ;;  %v1774_v34 = vlaneseq }
  0xa1   : > { %3331 = vmatprep.subr.msk.mxu0 %vm266_vm1, %v939_v38  ;;  %3456 = vmatprep.subr.mxu1 %v3641_v0 }
  0xa2   : > { %3332 = vmatpush1.msk.msra.mxu0 %vm266_vm1, %v938_v37  ;;  %3454 = vmatmul.mubr.msk.f32.vlgmr.msra.gmra.mxu1 %vm262_vm2, %v3330_v36 }
  0xa3   : > { %v1105_v39 = vpop.permute.xlu1 %1104  ;;  %v1103_v40 = vpop.permute.xlu0 %1102  ;;  %3333 = vmatmul.mubr.msk.f32.vlgmr.msra.gmra.mxu0 %vm262_vm2, %v3330_v36  ;;  %3458 = vmatprep.mubr.msk.f32.mxu1 %vm3642_vm0, %v3641_v0 }
  0xa4   : > { %v1108_v42 = vsel %vm1106_vm7, %v1103_v40, %v1105_v39  ;;  %3457 = vmatpush3.msk.msra.mxu1 %vm266_vm1, %v1105_v39  ;;  %1182 = vmatprep.mubr.f32.mxu0 %v3641_v0 }
  0xa5   : > { %3337 = vmatprep.subr.msk.mxu0 %vm266_vm1, %v1108_v42  ;;  %3461 = vmatprep.subr.mxu1 %v3641_v0 }
  0xa6   : > { %3459 = vmatmul.mubr.msk.f32.vlgmr.msra.gmra.mxu1 %vm262_vm2, %v3336_v41 }
  0xa7   : > { %v1272_v43 = vpop.permute.xlu1 %1271  ;;  %v1101_v44 = vpop.permute.xlu0 %1100  ;;  %3463 = vmatprep.mubr.msk.f32.mxu1 %vm3642_vm0, %v3641_v0 }
  0xa8   : > { %v1107_v45 = vsel %vm1106_vm7, %v1101_v44, %v1103_v40 }
  0xa9   : > { %3338 = vmatpush1.msk.msra.mxu0 %vm266_vm1, %v1107_v45 }
  0xaa   : > { %3339 = vmatmul.mubr.msk.f32.vlgmr.msra.gmra.mxu0 %vm262_vm2, %v3336_v41  ;;  %v1775_v41 = vshrl.u32 %v1774_v34, 7  ;;  %v3372_v34 = vld [vmem:[%s4109_s3 + $0x1c] sm:$0xf] }
  0xab   : > { %v1270_v47 = vpop.permute.xlu1 %1269  ;;  %v1274_v48 = vpop.permute.xlu0 %1273  ;;  %1351 = vmatprep.mubr.f32.mxu0 %v3641_v0 }
  0xac   : > { %v1276_v49 = vsel %vm1275_vm8, %v1270_v47, %v1272_v43  ;;  %v1277_v50 = vsel %vm1275_vm8, %v1272_v43, %v1274_v48  ;;  %3462 = vmatpush3.msk.msra.mxu1 %vm266_vm1, %v1274_v48  ;;  %v1784_v48 = vsub.s32 2, %v1775_v41 }
  0xad   : > { %3343 = vmatprep.subr.msk.mxu0 %vm266_vm1, %v1277_v50  ;;  %3464 = vmatmul.mubr.msk.f32.vlgmr.msra.gmra.mxu1 %vm262_vm2, %v3342_v46 }
  0xae   : > { %3344 = vmatpush1.msk.msra.mxu0 %vm266_vm1, %v1276_v49  ;;  %3466 = vmatprep.subr.mxu1 %v3641_v0 }
  0xaf   : > { %v1443_v52 = vpop.permute.xlu1 %1442  ;;  %v1441_v53 = vpop.permute.xlu0 %1440  ;;  %3345 = vmatmul.mubr.msk.f32.vlgmr.msra.gmra.mxu0 %vm262_vm2, %v3342_v46  ;;  %3468 = vmatprep.mubr.msk.f32.mxu1 %vm3642_vm0, %v3641_v0 }
  0xb0   : > { %v1446_v54 = vsel %vm1444_vm9, %v1441_v53, %v1443_v52  ;;  %3467 = vmatpush3.msk.msra.mxu1 %vm266_vm1, %v1443_v52  ;;  %1520 = vmatprep.mubr.f32.mxu0 %v3641_v0 }
  0xb1   : > { %3349 = vmatprep.subr.msk.mxu0 %vm266_vm1, %v1446_v54  ;;  %3469 = vmatmul.mubr.msk.f32.vlgmr.msra.gmra.mxu1 %vm262_vm2, %v3348_v51 }
  0xb2   : > { %3471 = vmatprep.subr.mxu1 %v3641_v0  ;;  %3473 = vmatprep.mubr.msk.f32.mxu1 %vm3642_vm0, %v3641_v0 }
  0xb3   : > { %v1610_v55 = vpop.permute.xlu1 %1609  ;;  %v1439_v56 = vpop.permute.xlu0 %1438 }
  0xb4   : > { %v1445_v57 = vsel %vm1444_vm9, %v1439_v56, %v1441_v53  ;;  %v1772_v53 = vld [vmem:[%s4111_s5] sm:$0x7] }
  0xb5   : > { %3350 = vmatpush1.msk.msra.mxu0 %vm266_vm1, %v1445_v57 }
  0xb6   : > { %3351 = vmatmul.mubr.msk.f32.vlgmr.msra.gmra.mxu0 %vm262_vm2, %v3348_v51 }
  0xb7   : > { %v1608_v59 = vpop.permute.xlu1 %1607  ;;  %v1612_v60 = vpop.permute.xlu0 %1611  ;;  %1689 = vmatprep.mubr.f32.mxu0 %v3641_v0 }
  0xb8   : > { %v1614_v61 = vsel %vm1613_vm10, %v1608_v59, %v1610_v55  ;;  %v1615_v62 = vsel %vm1613_vm10, %v1610_v55, %v1612_v60  ;;  %3472 = vmatpush3.msk.msra.mxu1 %vm266_vm1, %v1612_v60  ;;  %v1785_v60 = vrot.slane %v1772_v53, %v1784_v48 }
  0xb9   : > { %3355 = vmatprep.subr.msk.mxu0 %vm266_vm1, %v1615_v62  ;;  %3474 = vmatmul.mubr.msk.f32.vlgmr.msra.gmra.mxu1 %vm262_vm2, %v3354_v58 }
  0xba   : > { %3356 = vmatpush1.msk.msra.mxu0 %vm266_vm1, %v1614_v61  ;;  %3476 = vmatprep.subr.mxu1 %v3641_v0 }
  0xbb   : > { %3357 = vmatmul.mubr.msk.f32.vlgmr.msra.gmra.mxu0 %vm262_vm2, %v3354_v58  ;;  %3478 = vmatprep.mubr.msk.f32.mxu1 %vm3642_vm0, %v3641_v0  ;;  %v1776_v58 = vsub.s32 0, %v1775_v41 }
  0xbc   : > { %1874 = vmatprep.mubr.f32.mxu0 %v3641_v0 }
  0xc4   : > { %v254_v14 = vpop.permute.xlu0 %253 }
  0xde   : > { %v410_v63 = vpop.f32.mrf.mxu1  ;;  %v339_v3 = vpop.f32.mrf.mxu0 }
  0xdf   : > { %v416_v17 = vadd.f32 %v410_v63, %v254_v14  ;;  %v414_v19 = vadd.f32 %v339_v3, %v254_v14 }
  0xe0   : > { %v3435_v1 = vpop.f32.mrf.mxu1  ;;  %v341_v6 = vpop.f32.mrf.mxu0 }
  0xe1   : > { %v415_v24 = vadd.f32 %v341_v6, %v254_v14  ;;  %v1780_v1 = vsub.s32 1, %v1775_v41  ;;  %v3383_v41 = vld [vmem:[%s4109_s3 + $0x20] sm:$0xf] }
 0x14d   : > { %v579_v2 = vpop.f32.mrf.mxu1 }
 0x14e   : > { %v585_v22 = vadd.f32 %v579_v2, %v416_v17 }
 0x14f   : > { %v3440_v4 = vpop.f32.mrf.mxu1 }
 0x151   : > { %v748_v5 = vpop.f32.mrf.mxu1 }
 0x152   : > { %v754_v28 = vadd.f32 %v748_v5, %v585_v22 }
 0x153   : > { %v3445_v7 = vpop.f32.mrf.mxu1 }
 0x154   : > { %v1777_v7 = vrot.slane %v1772_v53, %v1776_v58 }
 0x157   : > { %v508_v8 = vpop.f32.mrf.mxu0 }
 0x158   : > { %v583_v25 = vadd.f32 %v508_v8, %v414_v19 }
 0x159   : > { %v510_v9 = vpop.f32.mrf.mxu0 }
 0x15a   : > { %v917_v10 = vpop.f32.mrf.mxu1  ;;  %v584_v31 = vadd.f32 %v510_v9, %v415_v24 }
 0x15b   : > { %v677_v11 = vpop.f32.mrf.mxu0  ;;  %v923_v35 = vadd.f32 %v917_v10, %v754_v28 }
 0x15c   : > { %v3450_v12 = vpop.f32.mrf.mxu1  ;;  %v752_v30 = vadd.f32 %v677_v11, %v583_v25 }
 0x15d   : > { %v679_v13 = vpop.f32.mrf.mxu0  ;;  %v1781_v12 = vrot.slane %v1772_v53, %v1780_v1 }
 0x15e   : > { %v753_v37 = vadd.f32 %v679_v13, %v584_v31  ;;  %v3369_v31 = vld [vmem:[%s4109_s3 + $0x4] sm:$0xf] }
 0x15f   : > { %v846_v15 = vpop.f32.mrf.mxu0 }
 0x160   : > { %v921_v38 = vadd.f32 %v846_v15, %v752_v30 }
 0x161   : > { %v848_v16 = vpop.f32.mrf.mxu0 }
 0x162   : > { %v1086_v18 = vpop.f32.mrf.mxu1  ;;  %v922_v44 = vadd.f32 %v848_v16, %v753_v37  ;;  %v3360_v16 = vld [vmem:[%s4109_s3 + $0x10] sm:$0xf]  ;;  %v2580_v37 = vld [vmem:[%s4109_s3] sm:$0xf] }
 0x163   : > { %v1015_v20 = vpop.f32.mrf.mxu0  ;;  %v1092_v42 = vadd.f32 %v1086_v18, %v923_v35  ;;  %v1800_v18 = vld [vmem:[%s4110_s4] sm:$0xf] }
 0x164   : > { %v3455_v21 = vpop.f32.mrf.mxu1  ;;  %v1090_v45 = vadd.f32 %v1015_v20, %v921_v38 }
 0x165   : > { %v1017_v26 = vpop.f32.mrf.mxu0  ;;  %v3363_v21 = vld [vmem:[%s4109_s3 + $0xc] sm:$0xf] }
 0x166   : > { %v1255_v23 = vpop.f32.mrf.mxu1  ;;  %v1091_v49 = vadd.f32 %v1017_v26, %v922_v44 }
 0x167   : > { %v1261_v46 = vadd.f32 %v1255_v23, %v1092_v42 }
 0x168   : > { %v3460_v27 = vpop.f32.mrf.mxu1 }
 0x169   : > { %v3366_v27 = vld [vmem:[%s4109_s3 + $0x14] sm:$0xf] }
 0x16a   : > { %v1184_v29 = vpop.f32.mrf.mxu0 }
 0x16b   : > { %v1259_v50 = vadd.f32 %v1184_v29, %v1090_v45 }
 0x16c   : > { %v1186_v32 = vpop.f32.mrf.mxu0 }
 0x16d   : > { %v1424_v33 = vpop.f32.mrf.mxu1  ;;  %v1260_v54 = vadd.f32 %v1186_v32, %v1091_v49 }
 0x16e   : > { %v1430_v51 = vadd.f32 %v1424_v33, %v1261_v46 }
 0x16f   : > { %v3465_v36 = vpop.f32.mrf.mxu1  ;;  %v1353_v39 = vpop.f32.mrf.mxu0 }
 0x170   : > { %v1428_v55 = vadd.f32 %v1353_v39, %v1259_v50  ;;  %v3377_v39 = vld [vmem:[%s4109_s3 + $0x8] sm:$0xf] }
 0x171   : > { %v1593_v40 = vpop.f32.mrf.mxu1  ;;  %v1355_v47 = vpop.f32.mrf.mxu0 }
 0x172   : > { %v1599_v56 = vadd.f32 %v1593_v40, %v1430_v51  ;;  %v1429_v61 = vadd.f32 %v1355_v47, %v1260_v54  ;;  %v3380_v40 = vld [vmem:[%s4109_s3 + $0x18] sm:$0xf] }
 0x173   : > { %v3470_v43 = vpop.f32.mrf.mxu1 }
 0x176   : > { %v1522_v52 = vpop.f32.mrf.mxu0 }
 0x177   : > { %v1597_v62 = vadd.f32 %v1522_v52, %v1428_v55 }
 0x178   : > { %v1524_v57 = vpop.f32.mrf.mxu0 }
 0x179   : > { %v1762_v59 = vpop.f32.mrf.mxu1  ;;  %v1598_v4 = vadd.f32 %v1524_v57, %v1429_v61 }
 0x17a   : > { %v1768_v63 = vadd.f32 %v1762_v59, %v1599_v56 }
 0x17b   : > { %v1691_v2 = vpop.f32.mrf.mxu0  ;;  %v3475_v3 = vpop.f32.mrf.mxu1 }
 0x17c   : > { %v1771_v5 = vmax.f32 %v1768_v63, 0.0  ;;  %v1766_v6 = vadd.f32 %v1691_v2, %v1597_v62 }
 0x17d   : > { %v1693_v8 = vpop.f32.mrf.mxu0 }
 0x17e   : > { %v1791_v9 = vmul.f32 %v1785_v60, %v1771_v5  ;;  %v1769_v10 = vmax.f32 %v1766_v6, 0.0  ;;  %v1767_v11 = vadd.f32 %v1693_v8, %v1598_v4 }
 0x180   : > { %1799 = vst.msk [vmem:[#allocation2 + $0x10] sm:$0xff] %vm1798_vm12, %v1791_v9  ;;  %v3893_v13 = vmul.f32 %v1777_v7, %v1769_v10  ;;  %v1770_v14 = vmax.f32 %v1767_v11, 0.0 }
 0x182   : > { %v3895_v15 = vmul.f32 %v1781_v12, %v1770_v14  ;;  %1964 = vrot.lane.b32.xlu0 %v3893_v13, %s3643_s14 }
 0x184   : > { %1966 = vrot.lane.b32.xlu1 %v3895_v15, %s3643_s14  ;;  %1840 = vmatprep.subr.mxu0 %v3895_v15 }
 0x185   : > { %1841 = vmatpush1.msra.mxu0 %v3893_v13 }
 0x186   : > { %3361 = vmatmul.mubr.msk.f32.vlgmr.msra.gmra.mxu0 %vm1806_vm13, %v3360_v16 }
 0x187   : > { %v3907_v17 = vld [vmem:[#allocation2 + $0x10] sm:$0xff]  ;;  %2042 = vmatprep.mubr.f32.mxu0 %v3641_v0 }
 0x188   : > { %3477 = vmatpush3.msra.mxu1 %v3907_v17  ;;  %2277 = vrot.lane.b32.xlu0 %v3907_v17, %s3645_s18 }
 0x189   : > { %1968 = vrot.lane.b32.xlu1 %v3907_v17, %s3643_s14  ;;  %3479 = vmatmul.mubr.msk.f32.vlgmr.msra.gmra.mxu1 %vm1806_vm13, %v3360_v16 }
 0x18a   : > { %3481 = vmatprep.subr.mxu1 %v3641_v0  ;;  %3483 = vmatprep.mubr.msk.f32.mxu1 %vm3642_vm0, %v3641_v0 }
 0x18c   : > { %2583 = vrot.lane.b32.xlu0 %v3895_v15, %s3646_s19 }
 0x18d   : > { %2275 = vrot.lane.b32.xlu1 %v3895_v15, %s3645_s18 }
 0x190   : > { %2581 = vrot.lane.b32.xlu0 %v3893_v13, %s3646_s19 }
 0x191   : > { %2273 = vrot.lane.b32.xlu1 %v3893_v13, %s3645_s18  ;;  %s3521_s18 = smul.u32 48, %s242_s9 }
 0x195   : > { %2585 = vrot.lane.b32.xlu1 %v3907_v17, %s3646_s19  ;;  %s4032_s19 = scalar_lea.vmem [#allocation3], %s3521_s18 }
 0x196   : > { %s3240_s11 = sshll.u32 %s4032_s19, 4  ;;  %s4061_s11 = int_to_ptr.vmem [resolvable:$true] %s3240_s11 }
 0x197   : > { %s3579_s16 = scalar_lea.vmem %s4061_s11, 768  ;;  %p3586_p0 = scmp.lt.s32.totalorder %s4061_s11, %s3584_s20 }
 0x198   : > { %p3580_p11 = scmp.ne.s32.totalorder %s4061_s11, %s3579_s16  ;;  %p3587_p1 = scmp.lt.s32.totalorder %s3585_s26, %s3579_s16 }
 0x199   : > { %1953 = vperm.xlu1 %3577, %v1800_v18  }
 0x19a   : > { %p3581_p12 = pnand %p3580_p11, %p3728_p5  ;;  %p3588_p2 = por %p3587_p1, %p3586_p0 }
 0x19c   : > { %p3582_p13 = pneg %p3581_p12 }
 0x19e   : > { %p3589_p3 = pnand %p3588_p2, %p3582_p13 }
 0x1f4   : > { %v1965_v20 = vpop.permute.xlu0 %1964 }
 0x1f6   : > { %v1967_v19 = vpop.permute.xlu1 %1966 }
 0x1f7   : > { %v3941_v24 = vsel %vm430_vm3, %v1965_v20, %v1967_v19 }
 0x1fa   : > { %v2278_v25 = vpop.permute.xlu0 %2277 }
 0x1fb   : > { %v3935_v22 = vpop.permute.xlu1 %1968 }
 0x1fc   : > { %3482 = vmatpush3.msra.mxu1 %v3935_v22  ;;  %v1971_v23 = vsel %vm430_vm3, %v1967_v19, %v3935_v22 }
 0x1fd   : > { %2008 = vmatprep.subr.mxu0 %v1971_v23  ;;  %3484 = vmatmul.mubr.msk.f32.vlgmr.msra.gmra.mxu1 %vm1806_vm13, %v3363_v21 }
 0x1fe   : > { %3486 = vmatprep.subr.mxu1 %v3641_v0  ;;  %2009 = vmatpush1.msra.mxu0 %v3941_v24  ;;  %v2584_v29 = vpop.permute.xlu0 %2583 }
 0x1ff   : > { %3487 = vmatpush3.msra.mxu1 %v3907_v17  ;;  %v2276_v26 = vpop.permute.xlu1 %2275  ;;  %3364 = vmatmul.mubr.msk.f32.vlgmr.msra.gmra.mxu0 %vm1806_vm13, %v3363_v21 }
 0x200   : > { %2157 = vmatprep.subr.mxu0 %v3895_v15  ;;  %3488 = vmatprep.mubr.msk.f32.mxu1 %vm3642_vm0, %v3641_v0  ;;  %v2280_v28 = vsel %vm768_vm5, %v2276_v26, %v2278_v25 }
 0x201   : > { %2158 = vmatpush1.msra.mxu0 %v3893_v13  ;;  %3491 = vmatprep.subr.mxu1 %v3641_v0 }
 0x202   : > { %3489 = vmatmul.mubr.msk.f32.vlgmr.msra.gmra.mxu1 %vm1806_vm13, %v3366_v27  ;;  %2317 = vmatprep.subr.mxu0 %v2280_v28  ;;  %v2582_v36 = vpop.permute.xlu0 %2581 }
 0x203   : > { %3492 = vmatpush3.msra.mxu1 %v2278_v25  ;;  %2191 = vmatprep.mubr.f32.mxu0 %v3641_v0  ;;  %v2274_v30 = vpop.permute.xlu1 %2273  ;;  %v2587_v38 = vsel %vm937_vm6, %v2582_v36, %v2584_v29 }
 0x204   : > { %v2279_v32 = vsel %vm768_vm5, %v2274_v30, %v2276_v26  ;;  %3367 = vmatmul.mubr.msk.f32.vlgmr.msra.gmra.mxu0 %vm1806_vm13, %v3366_v27  ;;  %3493 = vmatprep.mubr.msk.f32.mxu1 %vm3642_vm0, %v3641_v0 }
 0x205   : > { %3496 = vmatprep.subr.mxu1 %v3641_v0  ;;  %2318 = vmatpush1.msra.mxu0 %v2279_v32 }
 0x206   : > { %3494 = vmatmul.mubr.msk.f32.vlgmr.msra.gmra.mxu1 %vm1806_vm13, %v3369_v31  ;;  %2351 = vmatprep.mubr.f32.mxu0 %v3641_v0 }
 0x207   : > { %3497 = vmatpush3.msra.mxu1 %v3907_v17  ;;  %2466 = vmatprep.subr.mxu0 %v3895_v15  ;;  %v2586_v33 = vpop.permute.xlu1 %2585 }
 0x208   : > { %3370 = vmatmul.mubr.msk.f32.vlgmr.msra.gmra.mxu0 %vm1806_vm13, %v3369_v31  ;;  %3498 = vmatprep.mubr.msk.f32.mxu1 %vm3642_vm0, %v3641_v0  ;;  %v2588_v35 = vsel %vm937_vm6, %v2584_v29, %v2586_v33 }
 0x209   : > { %2467 = vmatpush1.msra.mxu0 %v3893_v13  ;;  %3501 = vmatprep.subr.mxu1 %v3641_v0 }
 0x20a   : > { %3499 = vmatmul.mubr.msk.f32.vlgmr.msra.gmra.mxu1 %vm1806_vm13, %v3372_v34  ;;  %2625 = vmatprep.subr.mxu0 %v2588_v35 }
 0x20b   : > { %3502 = vmatpush3.msra.mxu1 %v2586_v33  ;;  %2500 = vmatprep.mubr.f32.mxu0 %v3641_v0 }
 0x20c   : > { %3373 = vmatmul.mubr.msk.f32.vlgmr.msra.gmra.mxu0 %vm1806_vm13, %v3372_v34  ;;  %3503 = vmatprep.mubr.msk.f32.mxu1 %vm3642_vm0, %v3641_v0 }
 0x20d   : > { %2626 = vmatpush1.msra.mxu0 %v2587_v38  ;;  %3506 = vmatprep.subr.mxu1 %v3641_v0 }
 0x20e   : > { %2774 = vmatprep.subr.mxu0 %v2280_v28  ;;  %3504 = vmatmul.mubr.msk.f32.vlgmr.msra.gmra.mxu1 %vm1806_vm13, %v2580_v37 }
 0x20f   : > { %3507 = vmatpush3.msra.mxu1 %v2278_v25  ;;  %2659 = vmatprep.mubr.f32.mxu0 %v3641_v0 }
 0x210   : > { %3375 = vmatmul.mubr.msk.f32.vlgmr.msra.gmra.mxu0 %vm1806_vm13, %v2580_v37  ;;  %3508 = vmatprep.mubr.msk.f32.mxu1 %vm3642_vm0, %v3641_v0 }
 0x211   : > { %2775 = vmatpush1.msra.mxu0 %v2279_v32  ;;  %3511 = vmatprep.subr.mxu1 %v3641_v0 }
 0x212   : > { %2923 = vmatprep.subr.mxu0 %v1971_v23  ;;  %3509 = vmatmul.mubr.msk.f32.vlgmr.msra.gmra.mxu1 %vm1806_vm13, %v3377_v39 }
 0x213   : > { %3512 = vmatpush3.msra.mxu1 %v3935_v22  ;;  %2808 = vmatprep.mubr.f32.mxu0 %v3641_v0 }
 0x214   : > { %3378 = vmatmul.mubr.msk.f32.vlgmr.msra.gmra.mxu0 %vm1806_vm13, %v3377_v39  ;;  %3513 = vmatprep.mubr.msk.f32.mxu1 %vm3642_vm0, %v3641_v0  ;;  %v4024_v42 = vpop.permute.xlu1 %1953 }
 0x215   : > { %2924 = vmatpush1.msra.mxu0 %v3941_v24  ;;  %3516 = vmatprep.subr.mxu1 %v3641_v0 }
 0x216   : > { %3072 = vmatprep.subr.mxu0 %v3895_v15  ;;  %3514 = vmatmul.mubr.msk.f32.vlgmr.msra.gmra.mxu1 %vm1806_vm13, %v3380_v40 }
 0x217   : > { %3517 = vmatpush3.msra.mxu1 %v3907_v17  ;;  %2957 = vmatprep.mubr.f32.mxu0 %v3641_v0 }
 0x218   : > { %3381 = vmatmul.mubr.msk.f32.vlgmr.msra.gmra.mxu0 %vm1806_vm13, %v3380_v40  ;;  %3518 = vmatprep.mubr.msk.f32.mxu1 %vm3642_vm0, %v3641_v0 }
 0x219   : > { %3073 = vmatpush1.msra.mxu0 %v3893_v13  ;;  %3106 = vmatprep.mubr.f32.mxu0 %v3641_v0 }
 0x21a   : > { %3519 = vmatmul.mubr.msk.f32.vlgmr.msra.gmra.mxu1 %vm1806_vm13, %v3383_v41 }
 0x21c   : > { %3384 = vmatmul.mubr.msk.f32.vlgmr.msra.gmra.mxu0 %vm1806_vm13, %v3383_v41 }
 0x246   : > { %v1876_v43 = vpop.f32.mrf.mxu0 }
 0x247   : > { %v1956_v44 = vadd.f32 %v4024_v42, %v1876_v43 }
 0x248   : > { %v1878_v45 = vpop.f32.mrf.mxu0 }
 0x249   : > { %v1947_v46 = vpop.f32.mrf.mxu1  ;;  %v1957_v47 = vadd.f32 %v4024_v42, %v1878_v45  ;;  %v3186_v48 = vmax.f32 %v1956_v44, 0.0 }
 0x24a   : > { %v1958_v49 = vadd.f32 %v4024_v42, %v1947_v46 }
 0x24b   : > { %v3480_v0 = vpop.f32.mrf.mxu1  ;;  %v3187_v50 = vmax.f32 %v1957_v47, 0.0 }
 0x24c   : > { %v3188_v51 = vmax.f32 %v1958_v49, 0.0 }
 0x24d   : > { %v3191_v52 = vcombine.low %v3186_v48, %v3187_v50 }
 0x24e   : > { %3195 = vst.msk [vmem:[%s4032_s19 + $0x8] sm:$0xf] %vm3194_vm14, %v3188_v51 }
 0x24f   : > { %3193 = vst [vmem:[%s4032_s19] sm:$0xff] %v3191_v52 }
 0x2bd   : > { %v2115_v53 = vpop.f32.mrf.mxu1 }
 0x2be   : > { %v2121_v55 = vadd.f32 %v2115_v53, %v4024_v42 }
 0x2bf   : > { %v2044_v54 = vpop.f32.mrf.mxu0  ;;  %v3485_v56 = vpop.f32.mrf.mxu1 }
 0x2c0   : > { %v2119_v59 = vadd.f32 %v2044_v54, %v4024_v42 }
 0x2c1   : > { %v2046_v57 = vpop.f32.mrf.mxu0 }
 0x2c2   : > { %v2264_v58 = vpop.f32.mrf.mxu1  ;;  %v2120_v63 = vadd.f32 %v2046_v57, %v4024_v42 }
 0x2c3   : > { %v2270_v60 = vadd.f32 %v2264_v58, %v2121_v55 }
 0x2c4   : > { %v2193_v61 = vpop.f32.mrf.mxu0  ;;  %v3490_v62 = vpop.f32.mrf.mxu1 }
 0x2c5   : > { %v2268_v1 = vadd.f32 %v2193_v61, %v2119_v59  ;;  %v3198_v2 = vmax.f32 %v2270_v60, 0.0 }
 0x2c6   : > { %v2195_v3 = vpop.f32.mrf.mxu0  ;;  %v2424_v4 = vpop.f32.mrf.mxu1 }
 0x2c7   : > { %3387 = vst.msk [vmem:[%s4032_s19 + $0x14] sm:$0xf] %vm3194_vm14, %v3198_v2  ;;  %v2269_v5 = vadd.f32 %v2195_v3, %v2120_v63  ;;  %v2430_v6 = vadd.f32 %v2424_v4, %v4024_v42  ;;  %v3196_v9 = vmax.f32 %v2268_v1, 0.0 }
 0x2c8   : > { %v2353_v7 = vpop.f32.mrf.mxu0  ;;  %v3495_v8 = vpop.f32.mrf.mxu1 }
 0x2c9   : > { %v3197_v10 = vmax.f32 %v2269_v5, 0.0  ;;  %v2428_v14 = vadd.f32 %v2353_v7, %v4024_v42 }
 0x2ca   : > { %v2355_v11 = vpop.f32.mrf.mxu0  ;;  %v2573_v12 = vpop.f32.mrf.mxu1 }
 0x2cb   : > { %v3201_v13 = vcombine.low %v3196_v9, %v3197_v10  ;;  %v2579_v15 = vadd.f32 %v2573_v12, %v2430_v6  ;;  %v2429_v18 = vadd.f32 %v2355_v11, %v4024_v42 }
 0x2cc   : > { %v2502_v16 = vpop.f32.mrf.mxu0  ;;  %v3500_v17 = vpop.f32.mrf.mxu1 }
 0x2cd   : > { %3386 = vst [vmem:[%s4032_s19 + $0xc] sm:$0xff] %v3201_v13  ;;  %v2577_v19 = vadd.f32 %v2502_v16, %v2428_v14  ;;  %v3208_v20 = vmax.f32 %v2579_v15, 0.0 }
 0x2ce   : > { %v2504_v21 = vpop.f32.mrf.mxu0  ;;  %v2732_v22 = vpop.f32.mrf.mxu1 }
 0x2cf   : > { %3389 = vst.msk [vmem:[%s4032_s19 + $0x20] sm:$0xf] %vm3194_vm14, %v3208_v20  ;;  %v2578_v23 = vadd.f32 %v2504_v21, %v2429_v18  ;;  %v2738_v24 = vadd.f32 %v2732_v22, %v4024_v42  ;;  %v3206_v27 = vmax.f32 %v2577_v19, 0.0 }
 0x2d0   : > { %v2661_v25 = vpop.f32.mrf.mxu0  ;;  %v3505_v26 = vpop.f32.mrf.mxu1 }
 0x2d1   : > { %v3207_v28 = vmax.f32 %v2578_v23, 0.0  ;;  %v2736_v37 = vadd.f32 %v2661_v25, %v4024_v42 }
 0x2d2   : > { %v2663_v29 = vpop.f32.mrf.mxu0  ;;  %v2881_v30 = vpop.f32.mrf.mxu1 }
 0x2d3   : > { %v3211_v31 = vcombine.low %v3206_v27, %v3207_v28  ;;  %v2887_v32 = vadd.f32 %v2881_v30, %v2738_v24  ;;  %v2737_v41 = vadd.f32 %v2663_v29, %v4024_v42 }
 0x2d4   : > { %v2810_v33 = vpop.f32.mrf.mxu0  ;;  %v3510_v34 = vpop.f32.mrf.mxu1 }
 0x2d5   : > { %3388 = vst [vmem:[%s4032_s19 + $0x18] sm:$0xff] %v3211_v31  ;;  %v2885_v43 = vadd.f32 %v2810_v33, %v2736_v37 }
 0x2d6   : > { %v2812_v35 = vpop.f32.mrf.mxu0  ;;  %v3030_v36 = vpop.f32.mrf.mxu1 }
 0x2d7   : > { %v3036_v38 = vadd.f32 %v3030_v36, %v2887_v32  ;;  %v2886_v46 = vadd.f32 %v2812_v35, %v2737_v41 }
 0x2d8   : > { %v2959_v39 = vpop.f32.mrf.mxu0  ;;  %v3515_v40 = vpop.f32.mrf.mxu1 }
 0x2d9   : > { %v3034_v47 = vadd.f32 %v2959_v39, %v2885_v43 }
 0x2da   : > { %v2961_v44 = vpop.f32.mrf.mxu0  ;;  %v3179_v45 = vpop.f32.mrf.mxu1 }
 0x2db   : > { %v3185_v48 = vadd.f32 %v3179_v45, %v3036_v38  ;;  %v3035_v50 = vadd.f32 %v2961_v44, %v2886_v46 }
 0x2dc   : > { %v3108_v49 = vpop.f32.mrf.mxu0  ;;  %v3520_v0 = vpop.f32.mrf.mxu1 }
 0x2dd   : > { %v3183_v51 = vadd.f32 %v3108_v49, %v3034_v47  ;;  %v3218_v52 = vmax.f32 %v3185_v48, 0.0 }
 0x2de   : > { %v3110_v53 = vpop.f32.mrf.mxu0 }
 0x2df   : > { %3391 = vst.msk [vmem:[%s4032_s19 + $0x2c] sm:$0xf] %vm3194_vm14, %v3218_v52  ;;  %v3184_v42 = vadd.f32 %v3110_v53, %v3035_v50  ;;  %v3216_v54 = vmax.f32 %v3183_v51, 0.0 }
 0x2e1   : > { %v3217_v55 = vmax.f32 %v3184_v42, 0.0 }
 0x2e3   : > { %v3221_v56 = vcombine.low %v3216_v54, %v3217_v55 }
 0x2e5   : > { %3390 = vst [vmem:[%s4032_s19 + $0x24] sm:$0xff] %v3221_v56 }
 0x2e6   : > { %3592 = shalt.err (!%p3589_p3)
}
 0x2e7   : > { %s3593_s14 = scalar_lea.hbm %s4059_s15, 768  ;;  %s3597_s9 = scalar_lea.hbm %s4112_s6, 1536 }
 0x2e8   : > { %p3594_p4 = scmp.ne.s32.totalorder %s4059_s15, %s3593_s14  ;;  %p3598_p9 = scmp.lt.s32.totalorder %s4059_s15, %s4112_s6 }
 0x2e9   : > { %p3599_p10 = scmp.lt.s32.totalorder %s3597_s9, %s3593_s14 }
 0x2ea   : > { %p3595_p7 = pnand %p3594_p4, %p3728_p5 }
 0x2eb   : > { %p3600_p11 = por %p3599_p10, %p3598_p9 }
 0x2ec   : > { %p3596_p8 = pneg %p3595_p7 }
 0x2ee   : > { %p3601_p12 = pnand %p3600_p11, %p3596_p8 }
 0x2f0   : > { %3604 = shalt.err (!%p3601_p12)
}
 0x2f1   : > { %s3653_s10 = smov 192   ;;  %s3654_s12 = smov 12  }
 0x2f2   : > { %3524 = dma.vmem_to_hbm [thread:$0]  (%p3728_p5), %s4061_s11, 768, %s4059_s15, %s4066_s25, %s3653_s10, %s3653_s10, %s3654_s12  }
 0x2f3 PF: > { %p3530_p13 = scmp.ge.s32.totalorder %s3639_s24, 2  ;;  %s3255_s13 = sand.u32 1, %s3627_s21  }
 0x2f4   : > { %s3256_s16 = scalar_lea.sflag [#allocation4], %s3255_s13 }
 0x2f5   : > { %p3527_p0 = pnand %p3530_p13, %p3732_p6 }
 0x2f7   : > { %p3528_p1 = pneg %p3527_p0 }
 0x2f9   : > { %3622 = dma.done.wait (%p3528_p1), %s3256_s16, 768  }
 0x2fa   : > { %3624 = vsyncadd (%p3528_p1), %s3256_s16, 4294966528  ;;  %p16_p2 = scmp.ge.s32.totalorder %s3715_s27, 4   ;;  %s4115_s21 = smov %s3631_s22 }
 0x2fb   : > { %s4116_s22 = smov %s3635_s23  ;;  %s4117_s23 = smov %s3726_s30 }
 0x2fc   : > { %s4118_s24 = smov %s3715_s27  ;;  %18 = sbr.rel (!%p16_p2) target bundleno = 3 (0x3), region = 98 }
 0x301   :  { %3261 = vsyncpa [#allocation4], 1 }
 0x302   :  { %3263 = vsyncpa [#allocation4 + $0x1], 1 }

</bundles_post_ra>
